<compile_context>
chip_gen: v5e
topology: v5e:2x2
jax: 0.10.0
libtpu: 0.0.40
codegen_flags: <defaults>
</compile_context>

<pallas_src>
import jax
import jax.numpy as jnp
from jax.experimental import pallas as pl
from jax.experimental.pallas import tpu as pltpu


# ---------------------------------------------------------------------------
# Kernels
# ---------------------------------------------------------------------------
def _pool_sum_kernel(x_ref, acc_ref):
    """Accumulate per-(batch, channel) sums over the spatial (lane) axis.

    x_ref  : (bB, C, tS) input tile
    acc_ref: (bB, C, 1)  f32 accumulator, resident across the spatial grid axis
    """
    si = pl.program_id(1)

    @pl.when(si == 0)
    def _():
        acc_ref[...] = jnp.zeros_like(acc_ref)

    x = x_ref[...].astype(jnp.float32)                        # (bB, C, tS)
    acc_ref[...] += jnp.sum(x, axis=-1, keepdims=True)        # (bB, C, 1)


def _pool_sum_add_kernel(x_ref, r_ref, acc_ref, t_ref):
    """Fused residual add + pooled-sum accumulation.

    x_ref, r_ref: (bB, C, tS) input tiles
    acc_ref     : (bB, C, 1)  f32 accumulator (resident across spatial axis)
    t_ref       : (bB, C, tS) output tile holding x + residual
    """
    si = pl.program_id(1)

    @pl.when(si == 0)
    def _():
        acc_ref[...] = jnp.zeros_like(acc_ref)

    t = x_ref[...] + r_ref[...]                               # native dtype add
    t_ref[...] = t
    acc_ref[...] += jnp.sum(t.astype(jnp.float32), axis=-1, keepdims=True)


def _scale_kernel(x_ref, s_ref, o_ref):
    """Broadcast the per-channel gate over the spatial axis.

    x_ref: (bB, C, tS) input tile (native dtype)
    s_ref: (bB, C, 1)  gate, same dtype as x, sublane layout
    o_ref: (bB, C, tS) output tile
    """
    o_ref[...] = (x_ref[...] * s_ref[...]).astype(o_ref.dtype)


# ---------------------------------------------------------------------------
# Tiling helpers
# ---------------------------------------------------------------------------
def _round_up(a, m):
    return ((a + m - 1) // m) * m


def _choose_tiles(B, C, S, dtype_bytes):
    """Pick (bB, tS, S_pad): tS is a 128-multiple divisor of round_up(S, 128)."""
    S128 = _round_up(S, 128)
    n128 = S128 // 128

    # Spatial tile: <= ~2 MiB per single-batch (1, C, tS) slab, multiple of 128,
    # and dividing S128 exactly (minimal padding, no grid waste).
    target_tile_bytes = 2 * 1024 * 1024
    max_k = max(1, (target_tile_bytes // max(1, C * dtype_bytes)) // 128)
    k = 1
    for cand in range(min(max_k, n128), 0, -1):
        if n128 % cand == 0:
            k = cand
            break
    tS = 128 * k
    S_pad = S128  # tS divides S128 by construction

    # Batch blocking: amortize per-step pipeline overhead, keep tile <= ~4 MiB.
    max_tile_bytes = 4 * 1024 * 1024
    bB = 1
    for cand in range(min(B, 8), 0, -1):
        if B % cand == 0 and cand * C * tS * dtype_bytes <= max_tile_bytes:
            bB = cand
            break
    return bB, tS, S_pad


# ---------------------------------------------------------------------------
# Wrapper
# ---------------------------------------------------------------------------
def squeeze_excitation(x, w1, w2, residual=None):
    """x (and optional residual): (B, C, D, H, W); w1: (C, C//r); w2: (C//r, C).

    Returns (x + residual) * gate(x + residual) if residual is given, else
    x * gate(x) -- matching Qnet's attn(x + s) / Squeeze_Excitation.forward.
    """
    B, C, D, H, W = x.shape
    S = D * H * W
    dtype_bytes = jnp.dtype(x.dtype).itemsize

    bB, tS, S_pad = _choose_tiles(B, C, S, dtype_bytes)
    n_b = B // bB
    n_s = S_pad // tS
    tile_bytes = bB * C * tS * dtype_bytes
    # Up to ~8 double-buffered big tiles in flight (fused pass) + slack; keep
    # headroom on v7x's 64 MiB VMEM.
    vmem_limit = int(max(16 * 2 ** 20, min(8 * tile_bytes + 4 * 2 ** 20, 60 * 2 ** 20)))

    def _flat_pad(a):
        a = a.reshape(B, C, S)           # contiguous dims -> free reshape
        if S_pad != S:
            a = jnp.pad(a, ((0, 0), (0, 0), (0, S_pad - S)))   # <= 127 lanes of pad
        return a

    x_flat = _flat_pad(x)

    big_spec = pl.BlockSpec((bB, C, tS), lambda b, si: (b, 0, si))
    acc_spec = pl.BlockSpec((bB, C, 1), lambda b, si: (b, 0, 0))

    # --- pass 1: pooled sums (optionally fused with the residual add) -------
    if residual is None:
        pooled_sum = pl.pallas_call(
            _pool_sum_kernel,
            out_shape=jax.ShapeDtypeStruct((B, C, 1), jnp.float32),
            grid_spec=pltpu.PrefetchScalarGridSpec(
                num_scalar_prefetch=0,
                grid=(n_b, n_s),                               # reduction axis last
                in_specs=[big_spec],
                out_specs=acc_spec,
            ),
            compiler_params=pltpu.CompilerParams(
                dimension_semantics=("parallel", "arbitrary"),
                vmem_limit_bytes=vmem_limit,
            ),
            cost_estimate=pl.CostEstimate(
                flops=B * C * S_pad,
                transcendentals=0,
                bytes_accessed=B * C * S_pad * dtype_bytes + B * C * 4,
            ),
        )(x_flat)
        t_flat = x_flat
    else:
        r_flat = _flat_pad(residual)
        pooled_sum, t_flat = pl.pallas_call(
            _pool_sum_add_kernel,
            out_shape=(
                jax.ShapeDtypeStruct((B, C, 1), jnp.float32),
                jax.ShapeDtypeStruct((B, C, S_pad), x.dtype),
            ),
            grid_spec=pltpu.PrefetchScalarGridSpec(
                num_scalar_prefetch=0,
                grid=(n_b, n_s),
                in_specs=[big_spec, big_spec],
                out_specs=[acc_spec, big_spec],
            ),
            compiler_params=pltpu.CompilerParams(
                dimension_semantics=("parallel", "arbitrary"),
                vmem_limit_bytes=vmem_limit,
            ),
            cost_estimate=pl.CostEstimate(
                flops=2 * B * C * S_pad,
                transcendentals=0,
                bytes_accessed=3 * B * C * S_pad * dtype_bytes + B * C * 4,
            ),
        )(x_flat, r_flat)

    # --- excitation MLP (tiny) in plain JAX ---------------------------------
    pooled = pooled_sum[..., 0] / float(S)                     # divide by TRUE S
    h = jnp.maximum(
        jnp.dot(pooled, w1.astype(jnp.float32), preferred_element_type=jnp.float32),
        0.0,
    )
    gate = jax.nn.sigmoid(
        jnp.dot(h, w2.astype(jnp.float32), preferred_element_type=jnp.float32)
    )                                                          # (B, C)
    s_gate = gate.astype(x.dtype)[..., None]                   # (B, C, 1) sublane layout

    # --- pass 2: scale ------------------------------------------------------
    out_flat = pl.pallas_call(
        _scale_kernel,
        out_shape=jax.ShapeDtypeStruct((B, C, S_pad), x.dtype),
        grid_spec=pltpu.PrefetchScalarGridSpec(
            num_scalar_prefetch=0,
            grid=(n_b, n_s),
            in_specs=[big_spec, acc_spec],
            out_specs=big_spec,
        ),
        compiler_params=pltpu.CompilerParams(
            dimension_semantics=("parallel", "parallel"),
            vmem_limit_bytes=vmem_limit,
        ),
        cost_estimate=pl.CostEstimate(
            flops=B * C * S_pad,
            transcendentals=0,
            bytes_accessed=2 * B * C * S_pad * dtype_bytes + B * C * dtype_bytes,
        ),
    )(t_flat, s_gate)

    if S_pad != S:
        out_flat = out_flat[:, :, :S]
    return out_flat.reshape(B, C, D, H, W)


# ---------------------------------------------------------------------------
# Reference + test
# ---------------------------------------------------------------------------
def _reference_se(x, w1, w2, residual=None):
    t = x if residual is None else x + residual
    pooled = jnp.mean(t, axis=(2, 3, 4))                       # (B, C)
    h = jnp.maximum(pooled @ w1, 0.0)                          # (B, C//r)
    s = jax.nn.sigmoid(h @ w2)                                 # (B, C)
    return t * s[:, :, None, None, None]


if __name__ == "__main__":
    # Module config: channel=16, r=8 -> hidden = 2
    B, C, D, H, W = 2, 16, 4, 8, 8
    r = 8
    Hr = C // r

    key = jax.random.PRNGKey(0)
    kx, kr, k1, k2 = jax.random.split(key, 4)

    x = jax.random.normal(kx, (B, C, D, H, W), dtype=jnp.float32)
    res = jax.random.normal(kr, (B, C, D, H, W), dtype=jnp.float32)
    # torch Linear stores (out, in); we store transposed so y = x @ w.
    w1 = 0.1 * jax.random.normal(k1, (C, Hr), dtype=jnp.float32)   # Linear(C -> C//r), no bias
    w2 = 0.1 * jax.random.normal(k2, (Hr, C), dtype=jnp.float32)   # Linear(C//r -> C), no bias

    # Plain SE path (Squeeze_Excitation.forward).
    out = jax.block_until_ready(squeeze_excitation(x, w1, w2))
    ref = _reference_se(x, w1, w2)
    assert out.shape == (B, C, D, H, W)
    assert jnp.allclose(out, ref, atol=1e-5, rtol=1e-5), "mismatch vs reference (plain)"

    # Fused-residual path (attn(x + s) from Stem_Block / ResNet_Block).
    out_f = jax.block_until_ready(squeeze_excitation(x, w1, w2, residual=res))
    ref_f = _reference_se(x, w1, w2, residual=res)
    assert jnp.allclose(out_f, ref_f, atol=1e-5, rtol=1e-5), "mismatch vs reference (fused)"

    # Padding / ragged-spatial path (S = 3*5*7 = 105 -> padded to 128).
    Dp, Hp, Wp = 3, 5, 7
    xp = jax.random.normal(kx, (B, C, Dp, Hp, Wp), dtype=jnp.float32)
    out_p = jax.block_until_ready(squeeze_excitation(xp, w1, w2))
    ref_p = _reference_se(xp, w1, w2)
    assert jnp.allclose(out_p, ref_p, atol=1e-5, rtol=1e-5), "mismatch vs reference (padded)"

    print("KERNEL_OK")
</pallas_src>

<mosaic_0001>
module attributes {stable_mosaic.version = 11 : i64} {
  func.func @_pool_sum_kernel(%arg0: i32, %arg1: i32, %arg2: memref<2x16x256xf32, #tpu.memory_space<vmem>>, %arg3: memref<2x16x1xf32, #tpu.memory_space<vmem>>) attributes {dimension_semantics = [#tpu.dimension_semantics<parallel>, #tpu.dimension_semantics<arbitrary>], iteration_bounds = array<i64: 1, 1>, scalar_prefetch = 0 : i64, scratch_operands = 0 : i64, tpu.core_type = #tpu.core_type<tc>, window_params = [{transform_indices = @transform_0, window_bounds = array<i64: 2, 16, 256>}, {transform_indices = @transform_1, window_bounds = array<i64: 2, 16, 1>}]} {
    %c0_i32 = arith.constant 0 : i32
    %0 = arith.cmpi eq, %arg1, %c0_i32 : i32
    %1 = arith.extui %0 : i1 to i32
    %c0_i32_0 = arith.constant 0 : i32
    %2 = arith.cmpi ne, %1, %c0_i32_0 : i32
    scf.if %2 {
      %cst_9 = arith.constant 0.000000e+00 : f32
      %9 = vector.broadcast %cst_9 : f32 to vector<2x16x1xf32>
      %c0_10 = arith.constant 0 : index
      %c0_11 = arith.constant 0 : index
      %c0_12 = arith.constant 0 : index
      %10 = vector.load %arg3[%c0_10, %c0_11, %c0_12] : memref<2x16x1xf32, #tpu.memory_space<vmem>>, vector<2x16x1xf32>
      tpu.vector_store %arg3[%c0_10, %c0_11, %c0_12], %9 {strides = array<i32>} : memref<2x16x1xf32, #tpu.memory_space<vmem>>, vector<2x16x1xf32>,
    } else {
    }
    %c0 = arith.constant 0 : index
    %c0_1 = arith.constant 0 : index
    %c0_2 = arith.constant 0 : index
    %3 = vector.load %arg2[%c0, %c0_1, %c0_2] : memref<2x16x256xf32, #tpu.memory_space<vmem>>, vector<2x16x256xf32>
    %c0_3 = arith.constant 0 : index
    %c0_4 = arith.constant 0 : index
    %c0_5 = arith.constant 0 : index
    %4 = vector.load %arg3[%c0_3, %c0_4, %c0_5] : memref<2x16x1xf32, #tpu.memory_space<vmem>>, vector<2x16x1xf32>
    %cst = arith.constant dense<0.000000e+00> : vector<2x16xf32>
    %5 = vector.multi_reduction <add>, %3, %cst [2] : vector<2x16x256xf32> to vector<2x16xf32>
    %6 = vector.shape_cast %5 : vector<2x16xf32> to vector<2x16x1xf32>
    %7 = arith.addf %4, %6 : vector<2x16x1xf32>
    %c0_6 = arith.constant 0 : index
    %c0_7 = arith.constant 0 : index
    %c0_8 = arith.constant 0 : index
    %8 = vector.load %arg3[%c0_6, %c0_7, %c0_8] : memref<2x16x1xf32, #tpu.memory_space<vmem>>, vector<2x16x1xf32>
    tpu.vector_store %arg3[%c0_6, %c0_7, %c0_8], %7 {strides = array<i32>} : memref<2x16x1xf32, #tpu.memory_space<vmem>>, vector<2x16x1xf32>,
    return
  }
  func.func @transform_0(%arg0: i32, %arg1: i32) -> (i32, i32, i32) {
    %c0_i32 = arith.constant 0 : i32
    %c0_i32_0 = arith.constant 0 : i32
    return %arg0, %c0_i32, %arg1 : i32, i32, i32
  }
  func.func @transform_1(%arg0: i32, %arg1: i32) -> (i32, i32, i32) {
    %c0_i32 = arith.constant 0 : i32
    %c0_i32_0 = arith.constant 0 : i32
    %c0_i32_1 = arith.constant 0 : i32
    return %arg0, %c0_i32, %c0_i32_0 : i32, i32, i32
  }
}

</mosaic_0001>

<bundles_post_ra>
// kernel: tpu_custom_call.1
= control target key start
LH: loop header
LB: loop body
LE: loop exit
PB: predicated region body
PF: predicated region fallthrough
CT: control target
= control target key end

     0   :  { %6 = vsyncpa [#allocation3], 0  ;;  %s101_s9 = smov [#allocation2]   ;;  %s102_s11 = smov 256   ;;  %s162_s0 = inlined_call_operand.hbm [shape: f32[2,16,256], index: 0, kind: input, shape index: {}]   ;;  %s163_s1 = inlined_call_operand.vmem [shape: f32[2,16,1], index: 1, kind: output, shape index: {}]  }
   0x1   :  { %s11_s8 = sshll.u32 %s162_s0, 4  ;;  %s13_s10 = sshll.u32 %s101_s9, 4  ;;  %s12_s8 = int_to_ptr.hbm [resolvable:$true] %s11_s8  ;;  %s14_s10 = int_to_ptr.vmem [resolvable:$true] %s13_s10 }
   0x2   :  { %s103_s12 = smov 16  }
   0x3   :  { %19 = dma.hbm_to_vmem [thread:$0]  %s12_s8, 1024, %s14_s10, [#allocation3], %s102_s11, %s102_s11, %s103_s12  }
   0x4   :  { %99 = dma.done.wait [#allocation3], 1024  }
   0x5   :  { %100 = vsyncadd [#allocation3], 4294966272  ;;  %vm28_vm0 = vcmask 7168   ;;  %v104_v0 = vmov 0.0   ;;  %v37_v1 = vld [vmem:[#allocation2 + $0x20] sm:$0xff]  ;;  %v38_v2 = vld [vmem:[#allocation2 + $0x28] sm:$0xff] }
   0x6   :  { %31 = vst.msk [vmem:[%s163_s1 + $0x10] sm:$0xff] %vm28_vm0, %v104_v0  ;;  %v33_v3 = vld [vmem:[#allocation2] sm:$0xff]  ;;  %v51_v4 = vadd.f32 %v38_v2, %v37_v1  ;;  %v34_v5 = vld [vmem:[#allocation2 + $0x8] sm:$0xff]  ;;  %v39_v7 = vld [vmem:[#allocation2 + $0x30] sm:$0xff] }
   0x7   :  { %29 = vst.msk [vmem:[%s163_s1] sm:$0xff] %vm28_vm0, %v104_v0  ;;  %v45_v6 = vadd.f32 %v34_v5, %v33_v3  ;;  %v40_v8 = vld [vmem:[#allocation2 + $0x38] sm:$0xff]  ;;  %v35_v9 = vld [vmem:[#allocation2 + $0x10] sm:$0xff] }
   0x8   :  { %30 = vst.msk [vmem:[%s163_s1 + $0x8] sm:$0xff] %vm28_vm0, %v104_v0  ;;  %52 = vadd.xlane.f32.xlu1 %v51_v4  ;;  %v36_v10 = vld [vmem:[#allocation2 + $0x18] sm:$0xff]  ;;  %v54_v11 = vadd.f32 %v40_v8, %v39_v7 }
   0x9   :  { %32 = vst.msk [vmem:[%s163_s1 + $0x18] sm:$0xff] %vm28_vm0, %v104_v0  ;;  %46 = vadd.xlane.f32.xlu0 %v45_v6  ;;  %v48_v12 = vadd.f32 %v36_v10, %v35_v9 }
   0xd   :  { %v43_v13 = vld [vmem:[%s163_s1 + $0x10] sm:$0xff] }
   0xe   :  { %v41_v14 = vld [vmem:[%s163_s1] sm:$0xff] }
   0xf   :  { %v42_v20 = vld [vmem:[%s163_s1 + $0x8] sm:$0xff] }
  0x10   :  { %55 = vadd.xlane.f32.xlu1 %v54_v11  ;;  %v44_v19 = vld [vmem:[%s163_s1 + $0x18] sm:$0xff] }
  0x11   :  { %49 = vadd.xlane.f32.xlu0 %v48_v12 }
  0x7b   :  { %v53_v15 = vpop.xlane.xlu1 %52 }
  0x7c   :  { %v59_v16 = vadd.f32 %v53_v15, %v43_v13  ;;  %v47_v17 = vpop.xlane.xlu0 %46 }
  0x7d   :  { %v57_v18 = vadd.f32 %v47_v17, %v41_v14 }
  0x7e   :  { %64 = vst.msk [vmem:[%s163_s1 + $0x10] sm:$0xff] %vm28_vm0, %v59_v16 }
  0x7f   :  { %62 = vst.msk [vmem:[%s163_s1] sm:$0xff] %vm28_vm0, %v57_v18 }
  0x83   :  { %v56_v21 = vpop.xlane.xlu1 %55 }
  0x84   :  { %v60_v22 = vadd.f32 %v56_v21, %v44_v19  ;;  %v50_v23 = vpop.xlane.xlu0 %49 }
  0x85   :  { %v58_v24 = vadd.f32 %v50_v23, %v42_v20 }
  0x86   :  { %65 = vst.msk [vmem:[%s163_s1 + $0x18] sm:$0xff] %vm28_vm0, %v60_v22 }
  0x87   :  { %63 = vst.msk [vmem:[%s163_s1 + $0x8] sm:$0xff] %vm28_vm0, %v58_v24 }
  0x88   :  { %70 = vsyncpa [#allocation3], 1 }

</bundles_post_ra>
